<compile_context>
chip_gen: v7x
topology: tpu7x:2x2x1
jax: 0.10.0
libtpu: 0.0.40
codegen_flags: <defaults>
</compile_context>

<pallas_src>
import jax
import jax.numpy as jnp
from jax.experimental import pallas as pl
from jax.experimental.pallas import tpu as pltpu


# ---------------------------------------------------------------------------
# Kernel: one grid step handles NB batch elements; all three cSE blocks fused.
# ---------------------------------------------------------------------------
def cross_atten_conv_kernel(x1_ref, x2_ref, x3_ref, ws_ref, we_ref,
                            o1_ref, o2_ref, o3_ref):
    NB, C, HW = x1_ref.shape
    Ch = ws_ref.shape[0] // 3
    inv_hw = 1.0 / HW                                   # compile-time constant

    ws = ws_ref[...].astype(jnp.float32)                # (3*Ch, C)
    we = we_ref[...].astype(jnp.float32)                # (3*C, Ch)

    for n in range(NB):                                 # tiny static unroll
        # Pooled means straight from the refs (no long-lived (C,HW) values).
        # Column i of M feeds gate i+1: gate1<-x3, gate2<-x1, gate3<-x2.
        m3 = jnp.sum(x3_ref[n].astype(jnp.float32), axis=-1, keepdims=True) * inv_hw
        m1 = jnp.sum(x1_ref[n].astype(jnp.float32), axis=-1, keepdims=True) * inv_hw
        m2 = jnp.sum(x2_ref[n].astype(jnp.float32), axis=-1, keepdims=True) * inv_hw
        M = jnp.concatenate([m3, m1, m2], axis=1)                          # (C, 3)

        # Squeeze: ONE MXU pass for all three gates; take the block diagonal.
        Zf = jnp.maximum(
            jnp.dot(ws, M, preferred_element_type=jnp.float32), 0.0)       # (3Ch, 3)
        Z = jnp.concatenate([Zf[0 * Ch:1 * Ch, 0:1],
                             Zf[1 * Ch:2 * Ch, 1:2],
                             Zf[2 * Ch:3 * Ch, 2:3]], axis=1)               # (Ch, 3)

        # Excitation: second MXU pass + one batched EUP sigmoid.
        Gf = jax.nn.sigmoid(
            jnp.dot(we, Z, preferred_element_type=jnp.float32))            # (3C, 3)
        g1 = Gf[0 * C:1 * C, 0:1]                                          # (C, 1)
        g2 = Gf[1 * C:2 * C, 1:2]
        g3 = Gf[2 * C:3 * C, 2:3]

        # Gate and store immediately so each store can overlap the next math.
        o1_ref[n] = (x1_ref[n].astype(jnp.float32) * g1).astype(o1_ref.dtype)
        o2_ref[n] = (x2_ref[n].astype(jnp.float32) * g2).astype(o2_ref.dtype)
        o3_ref[n] = (x3_ref[n].astype(jnp.float32) * g3).astype(o3_ref.dtype)


# ---------------------------------------------------------------------------
# pallas_call wrapper (operates on (N, C, H*W) tensors + stacked weights).
# ---------------------------------------------------------------------------
def cross_atten_conv_flat(x1, x2, x3, ws_all, we_all):
    N, C, HW = x1.shape

    # Fold the batch into the block: whole problem in one grid step at small N.
    NB = N if N <= 8 else 8
    if N % NB:
        NB = 1
    grid_n = pl.cdiv(N, NB)

    x_spec = pl.BlockSpec((NB, C, HW), lambda n: (n, 0, 0))
    ws_spec = pl.BlockSpec(ws_all.shape, lambda n: (0, 0))
    we_spec = pl.BlockSpec(we_all.shape, lambda n: (0, 0))

    grid_spec = pltpu.PrefetchScalarGridSpec(
        num_scalar_prefetch=0,
        grid=(grid_n,),
        in_specs=[x_spec, x_spec, x_spec, ws_spec, we_spec],
        out_specs=[x_spec, x_spec, x_spec],
    )

    out_shape = [jax.ShapeDtypeStruct((N, C, HW), x1.dtype)] * 3

    # Only shard across TensorCores when each step already carries >=8 elems.
    dims = ("parallel",) if grid_n > 1 else ("arbitrary",)

    return pl.pallas_call(
        cross_atten_conv_kernel,
        out_shape=out_shape,
        grid_spec=grid_spec,
        compiler_params=pltpu.CompilerParams(dimension_semantics=dims),
    )(x1, x2, x3, ws_all, we_all)


@jax.jit
def cross_atten_conv(x1, x2, x3, p):
    # Contiguous-dim reshape (free): NCHW -> (N, C, H*W), HW on the lane axis.
    N, C, H, W = x1.shape
    flat = lambda x: x.reshape(N, C, H * W)
    # Stack the six tiny 1x1-conv weights into two slabs (fewer DMAs).
    ws_all = jnp.concatenate([p['ws1'], p['ws2'], p['ws3']], axis=0)   # (3*C//2, C)
    we_all = jnp.concatenate([p['we1'], p['we2'], p['we3']], axis=0)   # (3*C, C//2)
    o1, o2, o3 = cross_atten_conv_flat(flat(x1), flat(x2), flat(x3), ws_all, we_all)
    unflat = lambda x: x.reshape(N, C, H, W)
    return unflat(o1), unflat(o2), unflat(o3)


# ---------------------------------------------------------------------------
# Parameter construction (deterministic, synthetic) + pure-JAX reference.
# ---------------------------------------------------------------------------
def make_params(key, num_filters):
    C, Ch = num_filters, num_filters // 2
    ks = jax.random.split(key, 6)

    def w(k, o, i):
        return jax.random.normal(k, (o, i), jnp.float32) / jnp.sqrt(float(i))

    return dict(ws1=w(ks[0], Ch, C), we1=w(ks[1], C, Ch),
                ws2=w(ks[2], Ch, C), we2=w(ks[3], C, Ch),
                ws3=w(ks[4], Ch, C), we3=w(ks[5], C, Ch))


def cse_ref(U, x, ws, we):
    # U, x: (N, C, H, W); ws: (C//2, C); we: (C, C//2)
    z = jnp.mean(U, axis=(2, 3))                              # (N, C)
    z = jnp.maximum(jnp.einsum('nc,oc->no', z, ws), 0.0)      # (N, C//2)
    z = jax.nn.sigmoid(jnp.einsum('nh,oh->no', z, we))        # (N, C)
    return x * z[:, :, None, None]


def ref_forward(x1, x2, x3, p):
    o1 = cse_ref(x3, x1, p['ws1'], p['we1'])
    o2 = cse_ref(x1, x2, p['ws2'], p['we2'])
    o3 = cse_ref(x2, x3, p['ws3'], p['we3'])
    return o1, o2, o3


if __name__ == "__main__":
    # params = {'num_filters': 32}
    N, C, H, W = 2, 32, 16, 16

    key = jax.random.PRNGKey(0)
    k1, k2, k3, kp = jax.random.split(key, 4)
    x1 = jax.random.normal(k1, (N, C, H, W), jnp.float32)     # NCHW like PyTorch
    x2 = jax.random.normal(k2, (N, C, H, W), jnp.float32)
    x3 = jax.random.normal(k3, (N, C, H, W), jnp.float32)
    params = make_params(kp, C)

    o1, o2, o3 = cross_atten_conv(x1, x2, x3, params)
    jax.block_until_ready((o1, o2, o3))

    r1, r2, r3 = ref_forward(x1, x2, x3, params)
    for o, r in ((o1, r1), (o2, r2), (o3, r3)):
        assert o.shape == (N, C, H, W), o.shape
        assert o.dtype == x1.dtype, o.dtype
        assert jnp.allclose(o, r, rtol=1e-4, atol=1e-4), \
            float(jnp.max(jnp.abs(o - r)))

    print("KERNEL_OK")
</pallas_src>

<mosaic_0001>
module attributes {stable_mosaic.version = 11 : i64} {
  func.func @cross_atten_conv_kernel(%arg0: i32, %arg1: memref<2x32x256xf32, #tpu.memory_space<vmem>>, %arg2: memref<2x32x256xf32, #tpu.memory_space<vmem>>, %arg3: memref<2x32x256xf32, #tpu.memory_space<vmem>>, %arg4: memref<48x32xf32, #tpu.memory_space<vmem>>, %arg5: memref<96x16xf32, #tpu.memory_space<vmem>>, %arg6: memref<2x32x256xf32, #tpu.memory_space<vmem>>, %arg7: memref<2x32x256xf32, #tpu.memory_space<vmem>>, %arg8: memref<2x32x256xf32, #tpu.memory_space<vmem>>) attributes {dimension_semantics = [#tpu.dimension_semantics<arbitrary>], iteration_bounds = array<i64: 1>, scalar_prefetch = 0 : i64, scratch_operands = 0 : i64, tpu.core_type = #tpu.core_type<tc>, window_params = [{transform_indices = @transform_0, window_bounds = array<i64: 2, 32, 256>}, {transform_indices = @transform_1, window_bounds = array<i64: 2, 32, 256>}, {transform_indices = @transform_2, window_bounds = array<i64: 2, 32, 256>}, {pipeline_mode = #tpu.pipeline_mode<synchronous>, transform_indices = @transform_3, window_bounds = array<i64: 48, 32>}, {pipeline_mode = #tpu.pipeline_mode<synchronous>, transform_indices = @transform_4, window_bounds = array<i64: 96, 16>}, {transform_indices = @transform_5, window_bounds = array<i64: 2, 32, 256>}, {transform_indices = @transform_6, window_bounds = array<i64: 2, 32, 256>}, {transform_indices = @transform_7, window_bounds = array<i64: 2, 32, 256>}]} {
    %c0 = arith.constant 0 : index
    %c0_0 = arith.constant 0 : index
    %0 = vector.load %arg4[%c0, %c0_0] : memref<48x32xf32, #tpu.memory_space<vmem>>, vector<48x32xf32>
    %c0_1 = arith.constant 0 : index
    %c0_2 = arith.constant 0 : index
    %1 = vector.load %arg5[%c0_1, %c0_2] : memref<96x16xf32, #tpu.memory_space<vmem>>, vector<96x16xf32>
    %c0_3 = arith.constant 0 : index
    %c0_4 = arith.constant 0 : index
    %c0_5 = arith.constant 0 : index
    %2 = vector.load %arg3[%c0_3, %c0_4, %c0_5] : memref<2x32x256xf32, #tpu.memory_space<vmem>>, vector<1x32x256xf32>
    %3 = vector.shape_cast %2 : vector<1x32x256xf32> to vector<32x256xf32>
    %cst = arith.constant dense<0.000000e+00> : vector<32xf32>
    %4 = vector.multi_reduction <add>, %3, %cst [1] : vector<32x256xf32> to vector<32xf32>
    %5 = vector.shape_cast %4 : vector<32xf32> to vector<32x1xf32>
    %cst_6 = arith.constant 3.906250e-03 : f32
    %6 = vector.broadcast %cst_6 : f32 to vector<32x1xf32>
    %7 = arith.mulf %5, %6 : vector<32x1xf32>
    %c0_7 = arith.constant 0 : index
    %c0_8 = arith.constant 0 : index
    %c0_9 = arith.constant 0 : index
    %8 = vector.load %arg1[%c0_7, %c0_8, %c0_9] : memref<2x32x256xf32, #tpu.memory_space<vmem>>, vector<1x32x256xf32>
    %9 = vector.shape_cast %8 : vector<1x32x256xf32> to vector<32x256xf32>
    %cst_10 = arith.constant dense<0.000000e+00> : vector<32xf32>
    %10 = vector.multi_reduction <add>, %9, %cst_10 [1] : vector<32x256xf32> to vector<32xf32>
    %11 = vector.shape_cast %10 : vector<32xf32> to vector<32x1xf32>
    %cst_11 = arith.constant 3.906250e-03 : f32
    %12 = vector.broadcast %cst_11 : f32 to vector<32x1xf32>
    %13 = arith.mulf %11, %12 : vector<32x1xf32>
    %c0_12 = arith.constant 0 : index
    %c0_13 = arith.constant 0 : index
    %c0_14 = arith.constant 0 : index
    %14 = vector.load %arg2[%c0_12, %c0_13, %c0_14] : memref<2x32x256xf32, #tpu.memory_space<vmem>>, vector<1x32x256xf32>
    %15 = vector.shape_cast %14 : vector<1x32x256xf32> to vector<32x256xf32>
    %cst_15 = arith.constant dense<0.000000e+00> : vector<32xf32>
    %16 = vector.multi_reduction <add>, %15, %cst_15 [1] : vector<32x256xf32> to vector<32xf32>
    %17 = vector.shape_cast %16 : vector<32xf32> to vector<32x1xf32>
    %cst_16 = arith.constant 3.906250e-03 : f32
    %18 = vector.broadcast %cst_16 : f32 to vector<32x1xf32>
    %19 = arith.mulf %17, %18 : vector<32x1xf32>
    %20 = tpu.concatenate %7, %13, %19 in 1 : vector<32x1xf32>, vector<32x1xf32>, vector<32x1xf32> -> vector<32x3xf32>
    %cst_17 = arith.constant dense<0.000000e+00> : vector<48x3xf32>
    %21 = tpu.matmul %0, %20, %cst_17 {dimension_numbers = #tpu.dot_dimension_numbers<[1], [0], [0], [1], [0, 0, 1, 1], [], []>} : vector<48x32xf32>, vector<32x3xf32>, vector<48x3xf32> -> vector<48x3xf32>
    %cst_18 = arith.constant 0.000000e+00 : f32
    %22 = vector.broadcast %cst_18 : f32 to vector<48x3xf32>
    %23 = arith.maximumf %21, %22 : vector<48x3xf32>
    %24 = vector.extract_strided_slice %23 {offsets = [0, 0], sizes = [16, 1], strides = [1, 1]} : vector<48x3xf32> to vector<16x1xf32>
    %25 = vector.extract_strided_slice %23 {offsets = [16, 1], sizes = [16, 1], strides = [1, 1]} : vector<48x3xf32> to vector<16x1xf32>
    %26 = vector.extract_strided_slice %23 {offsets = [32, 2], sizes = [16, 1], strides = [1, 1]} : vector<48x3xf32> to vector<16x1xf32>
    %27 = tpu.concatenate %24, %25, %26 in 1 : vector<16x1xf32>, vector<16x1xf32>, vector<16x1xf32> -> vector<16x3xf32>
    %cst_19 = arith.constant dense<0.000000e+00> : vector<96x3xf32>
    %28 = tpu.matmul %1, %27, %cst_19 {dimension_numbers = #tpu.dot_dimension_numbers<[1], [0], [0], [1], [0, 0, 1, 1], [], []>} : vector<96x16xf32>, vector<16x3xf32>, vector<96x3xf32> -> vector<96x3xf32>
    %29 = arith.negf %28 : vector<96x3xf32>
    %30 = math.exp %29 : vector<96x3xf32>
    %cst_20 = arith.constant 1.000000e+00 : f32
    %31 = vector.broadcast %cst_20 : f32 to vector<96x3xf32>
    %32 = arith.addf %31, %30 : vector<96x3xf32>
    %33 = arith.divf %31, %32 : vector<96x3xf32>
    %34 = vector.extract_strided_slice %33 {offsets = [0, 0], sizes = [32, 1], strides = [1, 1]} : vector<96x3xf32> to vector<32x1xf32>
    %35 = vector.extract_strided_slice %33 {offsets = [32, 1], sizes = [32, 1], strides = [1, 1]} : vector<96x3xf32> to vector<32x1xf32>
    %36 = vector.extract_strided_slice %33 {offsets = [64, 2], sizes = [32, 1], strides = [1, 1]} : vector<96x3xf32> to vector<32x1xf32>
    %c0_21 = arith.constant 0 : index
    %c0_22 = arith.constant 0 : index
    %c0_23 = arith.constant 0 : index
    %37 = vector.load %arg1[%c0_21, %c0_22, %c0_23] : memref<2x32x256xf32, #tpu.memory_space<vmem>>, vector<1x32x256xf32>
    %38 = vector.shape_cast %37 : vector<1x32x256xf32> to vector<32x256xf32>
    %39 = vector.broadcast %34 : vector<32x1xf32> to vector<32x256xf32>
    %40 = arith.mulf %38, %39 : vector<32x256xf32>
    %c0_24 = arith.constant 0 : index
    %c0_25 = arith.constant 0 : index
    %c0_26 = arith.constant 0 : index
    %41 = vector.load %arg6[%c0_24, %c0_25, %c0_26] : memref<2x32x256xf32, #tpu.memory_space<vmem>>, vector<1x32x256xf32>
    %42 = vector.shape_cast %41 : vector<1x32x256xf32> to vector<32x256xf32>
    %43 = vector.shape_cast %40 : vector<32x256xf32> to vector<1x32x256xf32>
    tpu.vector_store %arg6[%c0_24, %c0_25, %c0_26], %43 {strides = array<i32>} : memref<2x32x256xf32, #tpu.memory_space<vmem>>, vector<1x32x256xf32>,
    %c0_27 = arith.constant 0 : index
    %c0_28 = arith.constant 0 : index
    %c0_29 = arith.constant 0 : index
    %44 = vector.load %arg2[%c0_27, %c0_28, %c0_29] : memref<2x32x256xf32, #tpu.memory_space<vmem>>, vector<1x32x256xf32>
    %45 = vector.shape_cast %44 : vector<1x32x256xf32> to vector<32x256xf32>
    %46 = vector.broadcast %35 : vector<32x1xf32> to vector<32x256xf32>
    %47 = arith.mulf %45, %46 : vector<32x256xf32>
    %c0_30 = arith.constant 0 : index
    %c0_31 = arith.constant 0 : index
    %c0_32 = arith.constant 0 : index
    %48 = vector.load %arg7[%c0_30, %c0_31, %c0_32] : memref<2x32x256xf32, #tpu.memory_space<vmem>>, vector<1x32x256xf32>
    %49 = vector.shape_cast %48 : vector<1x32x256xf32> to vector<32x256xf32>
    %50 = vector.shape_cast %47 : vector<32x256xf32> to vector<1x32x256xf32>
    tpu.vector_store %arg7[%c0_30, %c0_31, %c0_32], %50 {strides = array<i32>} : memref<2x32x256xf32, #tpu.memory_space<vmem>>, vector<1x32x256xf32>,
    %c0_33 = arith.constant 0 : index
    %c0_34 = arith.constant 0 : index
    %c0_35 = arith.constant 0 : index
    %51 = vector.load %arg3[%c0_33, %c0_34, %c0_35] : memref<2x32x256xf32, #tpu.memory_space<vmem>>, vector<1x32x256xf32>
    %52 = vector.shape_cast %51 : vector<1x32x256xf32> to vector<32x256xf32>
    %53 = vector.broadcast %36 : vector<32x1xf32> to vector<32x256xf32>
    %54 = arith.mulf %52, %53 : vector<32x256xf32>
    %c0_36 = arith.constant 0 : index
    %c0_37 = arith.constant 0 : index
    %c0_38 = arith.constant 0 : index
    %55 = vector.load %arg8[%c0_36, %c0_37, %c0_38] : memref<2x32x256xf32, #tpu.memory_space<vmem>>, vector<1x32x256xf32>
    %56 = vector.shape_cast %55 : vector<1x32x256xf32> to vector<32x256xf32>
    %57 = vector.shape_cast %54 : vector<32x256xf32> to vector<1x32x256xf32>
    tpu.vector_store %arg8[%c0_36, %c0_37, %c0_38], %57 {strides = array<i32>} : memref<2x32x256xf32, #tpu.memory_space<vmem>>, vector<1x32x256xf32>,
    %c1 = arith.constant 1 : index
    %c0_39 = arith.constant 0 : index
    %c0_40 = arith.constant 0 : index
    %58 = vector.load %arg3[%c1, %c0_39, %c0_40] : memref<2x32x256xf32, #tpu.memory_space<vmem>>, vector<1x32x256xf32>
    %59 = vector.shape_cast %58 : vector<1x32x256xf32> to vector<32x256xf32>
    %cst_41 = arith.constant dense<0.000000e+00> : vector<32xf32>
    %60 = vector.multi_reduction <add>, %59, %cst_41 [1] : vector<32x256xf32> to vector<32xf32>
    %61 = vector.shape_cast %60 : vector<32xf32> to vector<32x1xf32>
    %cst_42 = arith.constant 3.906250e-03 : f32
    %62 = vector.broadcast %cst_42 : f32 to vector<32x1xf32>
    %63 = arith.mulf %61, %62 : vector<32x1xf32>
    %c1_43 = arith.constant 1 : index
    %c0_44 = arith.constant 0 : index
    %c0_45 = arith.constant 0 : index
    %64 = vector.load %arg1[%c1_43, %c0_44, %c0_45] : memref<2x32x256xf32, #tpu.memory_space<vmem>>, vector<1x32x256xf32>
    %65 = vector.shape_cast %64 : vector<1x32x256xf32> to vector<32x256xf32>
    %cst_46 = arith.constant dense<0.000000e+00> : vector<32xf32>
    %66 = vector.multi_reduction <add>, %65, %cst_46 [1] : vector<32x256xf32> to vector<32xf32>
    %67 = vector.shape_cast %66 : vector<32xf32> to vector<32x1xf32>
    %cst_47 = arith.constant 3.906250e-03 : f32
    %68 = vector.broadcast %cst_47 : f32 to vector<32x1xf32>
    %69 = arith.mulf %67, %68 : vector<32x1xf32>
    %c1_48 = arith.constant 1 : index
    %c0_49 = arith.constant 0 : index
    %c0_50 = arith.constant 0 : index
    %70 = vector.load %arg2[%c1_48, %c0_49, %c0_50] : memref<2x32x256xf32, #tpu.memory_space<vmem>>, vector<1x32x256xf32>
    %71 = vector.shape_cast %70 : vector<1x32x256xf32> to vector<32x256xf32>
    %cst_51 = arith.constant dense<0.000000e+00> : vector<32xf32>
    %72 = vector.multi_reduction <add>, %71, %cst_51 [1] : vector<32x256xf32> to vector<32xf32>
    %73 = vector.shape_cast %72 : vector<32xf32> to vector<32x1xf32>
    %cst_52 = arith.constant 3.906250e-03 : f32
    %74 = vector.broadcast %cst_52 : f32 to vector<32x1xf32>
    %75 = arith.mulf %73, %74 : vector<32x1xf32>
    %76 = tpu.concatenate %63, %69, %75 in 1 : vector<32x1xf32>, vector<32x1xf32>, vector<32x1xf32> -> vector<32x3xf32>
    %cst_53 = arith.constant dense<0.000000e+00> : vector<48x3xf32>
    %77 = tpu.matmul %0, %76, %cst_53 {dimension_numbers = #tpu.dot_dimension_numbers<[1], [0], [0], [1], [0, 0, 1, 1], [], []>} : vector<48x32xf32>, vector<32x3xf32>, vector<48x3xf32> -> vector<48x3xf32>
    %cst_54 = arith.constant 0.000000e+00 : f32
    %78 = vector.broadcast %cst_54 : f32 to vector<48x3xf32>
    %79 = arith.maximumf %77, %78 : vector<48x3xf32>
    %80 = vector.extract_strided_slice %79 {offsets = [0, 0], sizes = [16, 1], strides = [1, 1]} : vector<48x3xf32> to vector<16x1xf32>
    %81 = vector.extract_strided_slice %79 {offsets = [16, 1], sizes = [16, 1], strides = [1, 1]} : vector<48x3xf32> to vector<16x1xf32>
    %82 = vector.extract_strided_slice %79 {offsets = [32, 2], sizes = [16, 1], strides = [1, 1]} : vector<48x3xf32> to vector<16x1xf32>
    %83 = tpu.concatenate %80, %81, %82 in 1 : vector<16x1xf32>, vector<16x1xf32>, vector<16x1xf32> -> vector<16x3xf32>
    %cst_55 = arith.constant dense<0.000000e+00> : vector<96x3xf32>
    %84 = tpu.matmul %1, %83, %cst_55 {dimension_numbers = #tpu.dot_dimension_numbers<[1], [0], [0], [1], [0, 0, 1, 1], [], []>} : vector<96x16xf32>, vector<16x3xf32>, vector<96x3xf32> -> vector<96x3xf32>
    %85 = arith.negf %84 : vector<96x3xf32>
    %86 = math.exp %85 : vector<96x3xf32>
    %cst_56 = arith.constant 1.000000e+00 : f32
    %87 = vector.broadcast %cst_56 : f32 to vector<96x3xf32>
    %88 = arith.addf %87, %86 : vector<96x3xf32>
    %89 = arith.divf %87, %88 : vector<96x3xf32>
    %90 = vector.extract_strided_slice %89 {offsets = [0, 0], sizes = [32, 1], strides = [1, 1]} : vector<96x3xf32> to vector<32x1xf32>
    %91 = vector.extract_strided_slice %89 {offsets = [32, 1], sizes = [32, 1], strides = [1, 1]} : vector<96x3xf32> to vector<32x1xf32>
    %92 = vector.extract_strided_slice %89 {offsets = [64, 2], sizes = [32, 1], strides = [1, 1]} : vector<96x3xf32> to vector<32x1xf32>
    %c1_57 = arith.constant 1 : index
    %c0_58 = arith.constant 0 : index
    %c0_59 = arith.constant 0 : index
    %93 = vector.load %arg1[%c1_57, %c0_58, %c0_59] : memref<2x32x256xf32, #tpu.memory_space<vmem>>, vector<1x32x256xf32>
    %94 = vector.shape_cast %93 : vector<1x32x256xf32> to vector<32x256xf32>
    %95 = vector.broadcast %90 : vector<32x1xf32> to vector<32x256xf32>
    %96 = arith.mulf %94, %95 : vector<32x256xf32>
    %c1_60 = arith.constant 1 : index
    %c0_61 = arith.constant 0 : index
    %c0_62 = arith.constant 0 : index
    %97 = vector.load %arg6[%c1_60, %c0_61, %c0_62] : memref<2x32x256xf32, #tpu.memory_space<vmem>>, vector<1x32x256xf32>
    %98 = vector.shape_cast %97 : vector<1x32x256xf32> to vector<32x256xf32>
    %99 = vector.shape_cast %96 : vector<32x256xf32> to vector<1x32x256xf32>
    tpu.vector_store %arg6[%c1_60, %c0_61, %c0_62], %99 {strides = array<i32>} : memref<2x32x256xf32, #tpu.memory_space<vmem>>, vector<1x32x256xf32>,
    %c1_63 = arith.constant 1 : index
    %c0_64 = arith.constant 0 : index
    %c0_65 = arith.constant 0 : index
    %100 = vector.load %arg2[%c1_63, %c0_64, %c0_65] : memref<2x32x256xf32, #tpu.memory_space<vmem>>, vector<1x32x256xf32>
    %101 = vector.shape_cast %100 : vector<1x32x256xf32> to vector<32x256xf32>
    %102 = vector.broadcast %91 : vector<32x1xf32> to vector<32x256xf32>
    %103 = arith.mulf %101, %102 : vector<32x256xf32>
    %c1_66 = arith.constant 1 : index
    %c0_67 = arith.constant 0 : index
    %c0_68 = arith.constant 0 : index
    %104 = vector.load %arg7[%c1_66, %c0_67, %c0_68] : memref<2x32x256xf32, #tpu.memory_space<vmem>>, vector<1x32x256xf32>
    %105 = vector.shape_cast %104 : vector<1x32x256xf32> to vector<32x256xf32>
    %106 = vector.shape_cast %103 : vector<32x256xf32> to vector<1x32x256xf32>
    tpu.vector_store %arg7[%c1_66, %c0_67, %c0_68], %106 {strides = array<i32>} : memref<2x32x256xf32, #tpu.memory_space<vmem>>, vector<1x32x256xf32>,
    %c1_69 = arith.constant 1 : index
    %c0_70 = arith.constant 0 : index
    %c0_71 = arith.constant 0 : index
    %107 = vector.load %arg3[%c1_69, %c0_70, %c0_71] : memref<2x32x256xf32, #tpu.memory_space<vmem>>, vector<1x32x256xf32>
    %108 = vector.shape_cast %107 : vector<1x32x256xf32> to vector<32x256xf32>
    %109 = vector.broadcast %92 : vector<32x1xf32> to vector<32x256xf32>
    %110 = arith.mulf %108, %109 : vector<32x256xf32>
    %c1_72 = arith.constant 1 : index
    %c0_73 = arith.constant 0 : index
    %c0_74 = arith.constant 0 : index
    %111 = vector.load %arg8[%c1_72, %c0_73, %c0_74] : memref<2x32x256xf32, #tpu.memory_space<vmem>>, vector<1x32x256xf32>
    %112 = vector.shape_cast %111 : vector<1x32x256xf32> to vector<32x256xf32>
    %113 = vector.shape_cast %110 : vector<32x256xf32> to vector<1x32x256xf32>
    tpu.vector_store %arg8[%c1_72, %c0_73, %c0_74], %113 {strides = array<i32>} : memref<2x32x256xf32, #tpu.memory_space<vmem>>, vector<1x32x256xf32>,
    return
  }
  func.func @transform_0(%arg0: i32) -> (i32, i32, i32) {
    %c0_i32 = arith.constant 0 : i32
    %c0_i32_0 = arith.constant 0 : i32
    %c0_i32_1 = arith.constant 0 : i32
    return %arg0, %c0_i32, %c0_i32_0 : i32, i32, i32
  }
  func.func @transform_1(%arg0: i32) -> (i32, i32, i32) {
    %c0_i32 = arith.constant 0 : i32
    %c0_i32_0 = arith.constant 0 : i32
    %c0_i32_1 = arith.constant 0 : i32
    return %arg0, %c0_i32, %c0_i32_0 : i32, i32, i32
  }
  func.func @transform_2(%arg0: i32) -> (i32, i32, i32) {
    %c0_i32 = arith.constant 0 : i32
    %c0_i32_0 = arith.constant 0 : i32
    %c0_i32_1 = arith.constant 0 : i32
    return %arg0, %c0_i32, %c0_i32_0 : i32, i32, i32
  }
  func.func @transform_3(%arg0: i32) -> (i32, i32) {
    %c0_i32 = arith.constant 0 : i32
    %c0_i32_0 = arith.constant 0 : i32
    %c0_i32_1 = arith.constant 0 : i32
    return %c0_i32, %c0_i32_0 : i32, i32
  }
  func.func @transform_4(%arg0: i32) -> (i32, i32) {
    %c0_i32 = arith.constant 0 : i32
    %c0_i32_0 = arith.constant 0 : i32
    %c0_i32_1 = arith.constant 0 : i32
    return %c0_i32, %c0_i32_0 : i32, i32
  }
  func.func @transform_5(%arg0: i32) -> (i32, i32, i32) {
    %c0_i32 = arith.constant 0 : i32
    %c0_i32_0 = arith.constant 0 : i32
    %c0_i32_1 = arith.constant 0 : i32
    return %arg0, %c0_i32, %c0_i32_0 : i32, i32, i32
  }
  func.func @transform_6(%arg0: i32) -> (i32, i32, i32) {
    %c0_i32 = arith.constant 0 : i32
    %c0_i32_0 = arith.constant 0 : i32
    %c0_i32_1 = arith.constant 0 : i32
    return %arg0, %c0_i32, %c0_i32_0 : i32, i32, i32
  }
  func.func @transform_7(%arg0: i32) -> (i32, i32, i32) {
    %c0_i32 = arith.constant 0 : i32
    %c0_i32_0 = arith.constant 0 : i32
    %c0_i32_1 = arith.constant 0 : i32
    return %arg0, %c0_i32, %c0_i32_0 : i32, i32, i32
  }
}

</mosaic_0001>

<bundles_post_ra>
// kernel: cross_atten_conv.1
= control target key start
LH: loop header
LB: loop body
LE: loop exit
PB: predicated region body
PF: predicated region fallthrough
CT: control target
= control target key end

     0   :  { %vm123_vm0 = vcmask 261120   ;;  %vm113_vm1 = vcmask 7168   ;;  %vm118_vm2 = vcmask 15360   ;;  %vm247_vm3 = vcmask 130048   ;;  %s2243_s2 = inlined_call_operand.vmem [shape: f32[2,32,256], index: 2, kind: input, shape index: {}]   ;;  %s2244_s0 = inlined_call_operand.vmem [shape: f32[2,32,256], index: 0, kind: input, shape index: {}]   ;;  %s2245_s1 = inlined_call_operand.vmem [shape: f32[2,32,256], index: 1, kind: input, shape index: {}]   ;;  %s2246_s3 = inlined_call_operand.vmem [shape: f32[48,32], index: 3, kind: input, shape index: {}]   ;;  %s2247_s4 = inlined_call_operand.vmem [shape: f32[96,16], index: 4, kind: input, shape index: {}]   ;;  %s2248_s5 = inlined_call_operand.vmem [shape: f32[2,32,256], index: 5, kind: output, shape index: {0}]   ;;  %s2249_s6 = inlined_call_operand.vmem [shape: f32[2,32,256], index: 6, kind: output, shape index: {1}]   ;;  %s2250_s7 = inlined_call_operand.vmem [shape: f32[2,32,256], index: 7, kind: output, shape index: {2}]  }
   0x1   :  { %v1573_v0 = vld [vmem:[%s2243_s2] sm:$0xff]  ;;  %v1578_v1 = vld [vmem:[%s2243_s2 + $0x8] sm:$0xff]  ;;  %v1595_v5 = vld [vmem:[%s2243_s2 + $0x10] sm:$0xff] }
   0x2   :  { %v1583_v2 = vld [vmem:[%s2244_s0] sm:$0xff]  ;;  %v49_v3 = vadd.f32 %v1578_v1, %v1573_v0  ;;  %v1590_v4 = vld [vmem:[%s2244_s0 + $0x8] sm:$0xff]  ;;  %v1600_v6 = vld [vmem:[%s2243_s2 + $0x18] sm:$0xff] }
   0x3   :  { %v73_v7 = vadd.f32 %v1590_v4, %v1583_v2  ;;  %v1607_v8 = vld [vmem:[%s2244_s0 + $0x10] sm:$0xff]  ;;  %v1612_v9 = vld [vmem:[%s2244_s0 + $0x18] sm:$0xff]  ;;  %v52_v10 = vadd.f32 %v1600_v6, %v1595_v5  ;;  %v1621_v12 = vld [vmem:[%s2245_s1] sm:$0xff] }
   0x4   :  { %50 = vadd.xlane.f32.xlu0 %v49_v3  ;;  %v76_v11 = vadd.f32 %v1612_v9, %v1607_v8  ;;  %v1626_v13 = vld [vmem:[%s2245_s1 + $0x8] sm:$0xff]  ;;  %v1631_v14 = vld [vmem:[%s2245_s1 + $0x10] sm:$0xff]  ;;  %v1636_v15 = vld [vmem:[%s2245_s1 + $0x18] sm:$0xff] }
   0x5   :  { %74 = vadd.xlane.f32.xlu1 %v73_v7  ;;  %v97_v16 = vadd.f32 %v1626_v13, %v1621_v12  ;;  %v100_v17 = vadd.f32 %v1636_v15, %v1631_v14  ;;  %v1645_v18 = vld [vmem:[%s2243_s2 + $0x20] sm:$0xff]  ;;  %v1650_v19 = vld [vmem:[%s2243_s2 + $0x28] sm:$0xff]  ;;  %v1655_v20 = vld [vmem:[%s2243_s2 + $0x30] sm:$0xff] }
   0x6   :  { %v1660_v21 = vld [vmem:[%s2243_s2 + $0x38] sm:$0xff]  ;;  %v55_v22 = vadd.f32 %v1650_v19, %v1645_v18  ;;  %v1669_v24 = vld [vmem:[%s2244_s0 + $0x20] sm:$0xff]  ;;  %v1674_v25 = vld [vmem:[%s2244_s0 + $0x28] sm:$0xff] }
   0x7   :  { %v58_v23 = vadd.f32 %v1660_v21, %v1655_v20  ;;  %v1679_v26 = vld [vmem:[%s2244_s0 + $0x30] sm:$0xff]  ;;  %v1684_v27 = vld [vmem:[%s2244_s0 + $0x38] sm:$0xff]  ;;  %v79_v28 = vadd.f32 %v1674_v25, %v1669_v24  ;;  %v1693_v30 = vld [vmem:[%s2245_s1 + $0x20] sm:$0xff] }
   0x8   :  { %53 = vadd.xlane.f32.xlu0 %v52_v10  ;;  %v82_v29 = vadd.f32 %v1684_v27, %v1679_v26  ;;  %v1698_v31 = vld [vmem:[%s2245_s1 + $0x28] sm:$0xff]  ;;  %v1703_v32 = vld [vmem:[%s2245_s1 + $0x30] sm:$0xff]  ;;  %v1708_v33 = vld [vmem:[%s2245_s1 + $0x38] sm:$0xff] }
   0x9   :  { %77 = vadd.xlane.f32.xlu1 %v76_v11  ;;  %v103_v34 = vadd.f32 %v1698_v31, %v1693_v30  ;;  %v106_v35 = vadd.f32 %v1708_v33, %v1703_v32  ;;  %v1717_v36 = vld [vmem:[%s2246_s3] sm:$0xff]  ;;  %v1160_v38 = vld [vmem:[%s2243_s2 + $0x48] sm:$0xff]  ;;  %v1161_v39 = vld [vmem:[%s2243_s2 + $0x50] sm:$0xff] }
   0xa   :  { %1309 = vmatprep.mubr.msk.f32.mxu0 %vm123_vm0, %v1717_v36  ;;  %v1159_v37 = vld [vmem:[%s2243_s2 + $0x40] sm:$0xff]  ;;  %v1162_v41 = vld [vmem:[%s2243_s2 + $0x58] sm:$0xff]  ;;  %v1741_v43 = vld [vmem:[%s2244_s0 + $0x48] sm:$0xff] }
   0xb   :  { %v614_v40 = vadd.f32 %v1160_v38, %v1159_v37  ;;  %v1736_v42 = vld [vmem:[%s2244_s0 + $0x40] sm:$0xff]  ;;  %2266 = vst [vmem:[#allocation3_spill] sm:$0xff] %v1741_v43  ;;  %v617_v44 = vadd.f32 %v1162_v41, %v1161_v39  ;;  %v1746_v45 = vld [vmem:[%s2244_s0 + $0x50] sm:$0xff]  ;;  %v1751_v46 = vld [vmem:[%s2244_s0 + $0x58] sm:$0xff] }
   0xc   :  { %98 = vadd.xlane.f32.xlu0 %v97_v16  ;;  %2265 = vst [vmem:[#allocation2_spill] sm:$0xff] %v1736_v42  ;;  %v639_v47 = vadd.f32 %v1741_v43, %v1736_v42  ;;  %v642_v48 = vadd.f32 %v1751_v46, %v1746_v45  ;;  %v1760_v49 = vld [vmem:[%s2245_s1 + $0x40] sm:$0xff]  ;;  %v1765_v50 = vld [vmem:[%s2245_s1 + $0x48] sm:$0xff]  ;;  %v1770_v51 = vld [vmem:[%s2245_s1 + $0x50] sm:$0xff] }
   0xd   :  { %101 = vadd.xlane.f32.xlu1 %v100_v17  ;;  %2267 = vst [vmem:[#allocation4_spill] sm:$0xff] %v1760_v49  ;;  %2268 = vst [vmem:[#allocation5_spill] sm:$0xff] %v1765_v50  ;;  %v1775_v52 = vld [vmem:[%s2245_s1 + $0x58] sm:$0xff]  ;;  %v664_v53 = vadd.f32 %v1765_v50, %v1760_v49  ;;  %v1163_v55 = vld [vmem:[%s2243_s2 + $0x60] sm:$0xff] }
   0xe   :  { %2269 = vst [vmem:[#allocation6_spill] sm:$0xff] %v1770_v51  ;;  %2270 = vst [vmem:[#allocation7_spill] sm:$0xff] %v1775_v52  ;;  %v667_v54 = vadd.f32 %v1775_v52, %v1770_v51  ;;  %v1164_v56 = vld [vmem:[%s2243_s2 + $0x68] sm:$0xff]  ;;  %v1165_v57 = vld [vmem:[%s2243_s2 + $0x70] sm:$0xff] }
   0xf   :  { %v1166_v58 = vld [vmem:[%s2243_s2 + $0x78] sm:$0xff]  ;;  %v620_v59 = vadd.f32 %v1164_v56, %v1163_v55  ;;  %v1796_v61 = vld [vmem:[%s2244_s0 + $0x60] sm:$0xff]  ;;  %v1801_v62 = vld [vmem:[%s2244_s0 + $0x68] sm:$0xff] }
  0x10   :  { %56 = vadd.xlane.f32.xlu0 %v55_v22  ;;  %v623_v60 = vadd.f32 %v1166_v58, %v1165_v57  ;;  %2271 = vst [vmem:[#allocation8_spill] sm:$0xff] %v1796_v61  ;;  %2272 = vst [vmem:[#allocation9_spill] sm:$0xff] %v1801_v62  ;;  %v1806_v63 = vld [vmem:[%s2244_s0 + $0x70] sm:$0xff]  ;;  %v1811_v3 = vld [vmem:[%s2244_s0 + $0x78] sm:$0xff]  ;;  %v645_v7 = vadd.f32 %v1801_v62, %v1796_v61 }
  0x11   :  { %59 = vadd.xlane.f32.xlu1 %v58_v23  ;;  %2273 = vst [vmem:[#allocation10_spill] sm:$0xff] %v1806_v63  ;;  %2274 = vst [vmem:[#allocation11_spill] sm:$0xff] %v1811_v3  ;;  %v648_v10 = vadd.f32 %v1811_v3, %v1806_v63  ;;  %v1820_v11 = vld [vmem:[%s2245_s1 + $0x60] sm:$0xff]  ;;  %v1825_v16 = vld [vmem:[%s2245_s1 + $0x68] sm:$0xff] }
  0x12   :  { %2275 = vst [vmem:[#allocation12_spill] sm:$0xff] %v1820_v11  ;;  %2276 = vst [vmem:[#allocation13_spill] sm:$0xff] %v1825_v16  ;;  %v1830_v17 = vld [vmem:[%s2245_s1 + $0x70] sm:$0xff]  ;;  %v1835_v22 = vld [vmem:[%s2245_s1 + $0x78] sm:$0xff]  ;;  %v670_v23 = vadd.f32 %v1825_v16, %v1820_v11 }
  0x13   :  { %2277 = vst [vmem:[#allocation14_spill] sm:$0xff] %v1830_v17  ;;  %2278 = vst [vmem:[#allocation15_spill] sm:$0xff] %v1835_v22 }
  0x14   :  { %80 = vadd.xlane.f32.xlu0 %v79_v28  ;;  %v673_v28 = vadd.f32 %v1835_v22, %v1830_v17 }
  0x15   :  { %83 = vadd.xlane.f32.xlu1 %v82_v29 }
  0x18   :  { %104 = vadd.xlane.f32.xlu0 %v103_v34 }
  0x19   :  { %107 = vadd.xlane.f32.xlu1 %v106_v35 }
  0x1c   :  { %615 = vadd.xlane.f32.xlu0 %v614_v40 }
  0x1d   :  { %618 = vadd.xlane.f32.xlu1 %v617_v44 }
  0x20   :  { %640 = vadd.xlane.f32.xlu0 %v639_v47 }
  0x21   :  { %643 = vadd.xlane.f32.xlu1 %v642_v48 }
  0x24   :  { %665 = vadd.xlane.f32.xlu0 %v664_v53 }
  0x25   :  { %668 = vadd.xlane.f32.xlu1 %v667_v54 }
  0x28   :  { %621 = vadd.xlane.f32.xlu0 %v620_v59 }
  0x29   :  { %624 = vadd.xlane.f32.xlu1 %v623_v60 }
  0x2c   :  { %646 = vadd.xlane.f32.xlu0 %v645_v7 }
  0x2d   :  { %649 = vadd.xlane.f32.xlu1 %v648_v10 }
  0x30   :  { %671 = vadd.xlane.f32.xlu0 %v670_v23 }
  0x31   :  { %674 = vadd.xlane.f32.xlu1 %v673_v28 }
  0x91   :  { %v51_v29 = vpop.xlane.xlu0 %50 }
  0x92   :  { %v75_v34 = vpop.xlane.xlu1 %74  ;;  %v61_v38 = vmul.f32 0.00390625, %v51_v29 }
  0x93   :  { %v85_v39 = vmul.f32 0.00390625, %v75_v34 }
  0x95   :  { %v54_v35 = vpop.xlane.xlu0 %53  ;;  %v114_v54 = vsel %vm113_vm1, %v61_v38, %v85_v39 }
  0x96   :  { %v78_v37 = vpop.xlane.xlu1 %77  ;;  %v62_v40 = vmul.f32 0.00390625, %v54_v35 }
  0x97   :  { %v86_v41 = vmul.f32 0.00390625, %v78_v37 }
  0x99   :  { %v99_v44 = vpop.xlane.xlu0 %98  ;;  %v115_v55 = vsel %vm113_vm1, %v62_v40, %v86_v41 }
  0x9a   :  { %v109_v47 = vmul.f32 0.00390625, %v99_v44  ;;  %v102_v48 = vpop.xlane.xlu1 %101 }
  0x9b   :  { %v110_v53 = vmul.f32 0.00390625, %v102_v48 }
  0x9c   :  { %v119_v56 = vsel %vm118_vm2, %v114_v54, %v109_v47  ;;  %v1857_v54 = vld [vmem:[%s2246_s3 + $0x10] sm:$0xff] }
  0x9d   :  { %v57_v57 = vpop.xlane.xlu0 %56  ;;  %v120_v58 = vsel %vm118_vm2, %v115_v55, %v110_v53  ;;  %v1852_v53 = vld [vmem:[%s2246_s3 + $0x8] sm:$0xff]  ;;  %v1866_v55 = vld [vmem:[%s2246_s3 + $0x18] sm:$0xff] }
  0x9e   :  { %v60_v59 = vpop.xlane.xlu1 %59  ;;  %v1379_v60 = vpack.c.bf16 %v120_v58, %v119_v56  ;;  %v63_v29 = vmul.f32 0.00390625, %v57_v57  ;;  %v1871_v56 = vld [vmem:[%s2246_s3 + $0x20] sm:$0xff]  ;;  %v1880_v57 = vld [vmem:[%s2246_s3 + $0x28] sm:$0xff] }
  0x9f   :  { %v64_v35 = vmul.f32 0.00390625, %v60_v59  ;;  %v1887_v58 = vld [vmem:[%s2247_s4] sm:$0xff] }
  0xa0   :  { %1380 = vmatprep.subr.bf16.mxu0 %v1379_v60  ;;  %v1894_v59 = vld [vmem:[%s2247_s4 + $0x20] sm:$0xff] }
  0xa1   :  { %1382 = vmatpush3.bf16.msra.mxu0 %v1379_v60  ;;  %v81_v7 = vpop.xlane.xlu0 %80  ;;  %1328 = vmatprep.mubr.msk.f32.mxu1 %vm247_vm3, %v1894_v59 }
  0xa2   :  { %v84_v10 = vpop.xlane.xlu1 %83  ;;  %v87_v23 = vmul.f32 0.00390625, %v81_v7 }
  0xa3   :  { %v88_v28 = vmul.f32 0.00390625, %v84_v10 }
  0xa4   :  { %v116_v39 = vsel %vm113_vm1, %v63_v29, %v87_v23 }
  0xa5   :  { %v105_v34 = vpop.xlane.xlu0 %104  ;;  %v117_v41 = vsel %vm113_vm1, %v64_v35, %v88_v28 }
  0xa6   :  { %v111_v37 = vmul.f32 0.00390625, %v105_v34  ;;  %v108_v38 = vpop.xlane.xlu1 %107 }
  0xa7   :  { %v112_v40 = vmul.f32 0.00390625, %v108_v38 }
  0xa8   :  { %v121_v44 = vsel %vm118_vm2, %v116_v39, %v111_v37 }
  0xa9   :  { %v122_v47 = vsel %vm118_vm2, %v117_v41, %v112_v40  ;;  %v616_v60 = vpop.xlane.xlu0 %615 }
  0xaa   :  { %v1383_v48 = vpack.c.bf16 %v122_v47, %v121_v44  ;;  %v619_v7 = vpop.xlane.xlu1 %618  ;;  %v626_v40 = vmul.f32 0.00390625, %v616_v60 }
  0xab   :  { %v627_v47 = vmul.f32 0.00390625, %v619_v7 }
  0xac   :  { %1384 = vmatprep.subr.bf16.mxu0 %v1383_v48 }
  0xad   :  { %1386 = vmatpush3.bf16.msra.mxu0 %v1383_v48  ;;  %v641_v10 = vpop.xlane.xlu0 %640 }
  0xae   :  { %v644_v23 = vpop.xlane.xlu1 %643  ;;  %v651_v41 = vmul.f32 0.00390625, %v641_v10 }
  0xaf   :  { %v652_v48 = vmul.f32 0.00390625, %v644_v23 }
  0xb0   :  { %1310 = vmatmul.mubr.msk.f32.vlgmr.msra.gmra.mrb[0].mxu0 %vm123_vm0, %v1852_v53  ;;  %v680_v50 = vsel %vm113_vm1, %v626_v40, %v651_v41  ;;  %v1944_v41 = vld [vmem:[%s2247_s4 + $0x38] sm:$0xff] }
  0xb1   :  { %1312 = vmatprep.mubr.msk.f32.mxu0 %vm123_vm0, %v1857_v54  ;;  %v666_v28 = vpop.xlane.xlu0 %665  ;;  %v681_v63 = vsel %vm113_vm1, %v627_v47, %v652_v48 }
  0xb2   :  { %v669_v29 = vpop.xlane.xlu1 %668  ;;  %v676_v49 = vmul.f32 0.00390625, %v666_v28 }
  0xb3   :  { %v677_v62 = vmul.f32 0.00390625, %v669_v29 }
  0xb4   :  { %1313 = vmatmul.mubr.msk.f32.gmra.mrb[2].mxu0 %vm123_vm0, %v1866_v55  ;;  %v684_v28 = vsel %vm118_vm2, %v680_v50, %v676_v49 }
  0xb5   :  { %1315 = vmatprep.mubr.msk.f32.mxu0 %vm123_vm0, %v1871_v56  ;;  %v622_v34 = vpop.xlane.xlu0 %621 }
  0xb6   :  { %v625_v35 = vpop.xlane.xlu1 %624  ;;  %v628_v61 = vmul.f32 0.00390625, %v622_v34  ;;  %v685_v34 = vsel %vm118_vm2, %v681_v63, %v677_v62  ;;  %v1928_v62 = vld [vmem:[%s2247_s4 + $0x30] sm:$0xff] }
  0xb7   :  { %v629_v23 = vmul.f32 0.00390625, %v625_v35 }
  0xb8   :  { %1316 = vmatmul.mubr.msk.f32.gmra.mrb[4].mxu0 %vm123_vm0, %v1880_v57 }
  0xb9   :  { %1322 = vmatprep.mubr.msk.f32.mxu0 %vm247_vm3, %v1887_v58  ;;  %v647_v39 = vpop.xlane.xlu0 %646 }
  0xba   :  { %v650_v44 = vpop.xlane.xlu1 %649  ;;  %v653_v43 = vmul.f32 0.00390625, %v647_v39  ;;  %v1391_v39 = vpack.c.bf16 %v685_v34, %v684_v28 }
  0xbd   :  { %v672_v7 = vpop.xlane.xlu0 %671 }
 0x183   :  { %v1311_v37 = vpop.f32.mrb[0].mxu0 }
 0x184   :  { %v208_v38 = vpop.f32.mrb[1].mxu0  ;;  %v238_v11 = vmax.f32 %v1311_v37, 0.0  ;;  %v654_v37 = vmul.f32 0.00390625, %v650_v44  ;;  %v1967_v44 = vld [vmem:[%s2247_s4 + $0x40] sm:$0xff] }
 0x185   :  { %v237_v52 = vmax.f32 %v208_v38, 0.0  ;;  %v675_v38 = vpop.xlane.xlu1 %674 }
 0x186   :  { %v679_v29 = vmul.f32 0.00390625, %v675_v38 }
 0x187   :  { %v1314_v16 = vpop.f32.mrb[2].mxu0 }
 0x188   :  { %v240_v22 = vmax.f32 %v1314_v16, 0.0  ;;  %v218_v17 = vpop.f32.mrb[3].mxu0 }
 0x189   :  { %v239_v51 = vmax.f32 %v218_v17, 0.0 }
 0x18a   :  { %v244_v3 = vsel %vm113_vm1, %v238_v11, %v240_v22  ;;  %v678_v22 = vmul.f32 0.00390625, %v672_v7 }
 0x18b   :  { %v243_v60 = vsel %vm113_vm1, %v237_v52, %v239_v51  ;;  %v1317_v10 = vpop.f32.mrb[4].mxu0  ;;  %v682_v51 = vsel %vm113_vm1, %v628_v61, %v653_v43  ;;  %v683_v52 = vsel %vm113_vm1, %v629_v23, %v654_v37  ;;  %v1918_v43 = vld [vmem:[%s2247_s4 + $0x28] sm:$0xff]  ;;  %v1923_v61 = vld [vmem:[%s2247_s4 + $0x10] sm:$0xff] }
 0x18c   :  { %v242_v16 = vmax.f32 %v1317_v10, 0.0  ;;  %v228_v42 = vpop.f32.mrb[5].mxu0  ;;  %v686_v49 = vsel %vm118_vm2, %v682_v51, %v678_v22  ;;  %v687_v50 = vsel %vm118_vm2, %v683_v52, %v679_v29 }
 0x18d   :  { %v241_v17 = vmax.f32 %v228_v42, 0.0  ;;  %v1911_v42 = vld [vmem:[%s2247_s4 + $0x8] sm:$0xff]  ;;  %v1395_v63 = vpack.c.bf16 %v687_v50, %v686_v49 }
 0x18e   :  { %v246_v40 = vsel %vm118_vm2, %v244_v3, %v242_v16  ;;  %v1939_v3 = vld [vmem:[%s2247_s4 + $0x18] sm:$0xff] }
 0x18f   :  { %v245_v11 = vsel %vm118_vm2, %v243_v60, %v241_v17 }
 0x190   :  { %v1387_v35 = vpack.c.bf16 %v246_v40, %v245_v11 }
 0x192   :  { %1388 = vmatprep.subr.bf16.mxu0 %v1387_v35  ;;  %1403 = vmatprep.subr.bf16.mxu1 %v1387_v35 }
 0x193   :  { %1390 = vmatpush3.bf16.msra.mxu0 %v1387_v35  ;;  %1404 = vmatpush3.bf16.msra.mxu1 %v1387_v35 }
 0x194   :  { %1392 = vmatprep.subr.bf16.mxu0 %v1391_v39 }
 0x196   :  { %1323 = vmatmul.mubr.msk.f32.vlgmr.msra.gmra.mrb[6].mxu0 %vm247_vm3, %v1911_v42  ;;  %1329 = vmatmul.mubr.msk.f32.vlgmr.msra.gmra.mrb[0].mxu1 %vm247_vm3, %v1918_v43 }
 0x197   :  { %1394 = vmatpush3.bf16.msra.mxu0 %v1391_v39  ;;  %1325 = vmatprep.mubr.msk.f32.mxu0 %vm247_vm3, %v1923_v61 }
 0x198   :  { %1396 = vmatprep.subr.bf16.mxu0 %v1395_v63  ;;  %1331 = vmatprep.mubr.msk.f32.mxu1 %vm247_vm3, %v1928_v62 }
 0x19a   :  { %1326 = vmatmul.mubr.msk.f32.gmra.mrb[8].mxu0 %vm247_vm3, %v1939_v3  ;;  %1332 = vmatmul.mubr.msk.f32.gmra.mrb[2].mxu1 %vm247_vm3, %v1944_v41 }
 0x19b   :  { %1398 = vmatpush3.bf16.msra.mxu0 %v1395_v63  ;;  %1348 = vmatprep.mubr.msk.f32.mxu0 %vm123_vm0, %v1717_v36  ;;  %v1974_v36 = vld [vmem:[%s2247_s4 + $0x48] sm:$0xff] }
 0x19c   :  { %1334 = vmatprep.mubr.msk.f32.mxu1 %vm247_vm3, %v1967_v44 }
 0x19e   :  { %1349 = vmatmul.mubr.msk.f32.vlgmr.msra.gmra.mrb[10].mxu0 %vm123_vm0, %v1852_v53  ;;  %1335 = vmatmul.mubr.msk.f32.gmra.mrb[4].mxu1 %vm247_vm3, %v1974_v36  ;;  %v1981_v53 = vld [vmem:[%s2247_s4 + $0x50] sm:$0xff] }
 0x19f   :  { %1351 = vmatprep.mubr.msk.f32.mxu0 %vm123_vm0, %v1857_v54  ;;  %1337 = vmatprep.mubr.msk.f32.mxu1 %vm247_vm3, %v1981_v53  ;;  %v1988_v54 = vld [vmem:[%s2247_s4 + $0x58] sm:$0xff] }
 0x1a2   :  { %1352 = vmatmul.mubr.msk.f32.gmra.mrb[12].mxu0 %vm123_vm0, %v1866_v55  ;;  %1338 = vmatmul.mubr.msk.f32.gmra.mrb[6].mxu1 %vm247_vm3, %v1988_v54  ;;  %v1527_v55 = vmov 0  }
 0x1a3   :  { %1354 = vmatprep.mubr.msk.f32.mxu0 %vm123_vm0, %v1871_v56  ;;  %1361 = vmatprep.mubr.msk.f32.mxu1 %vm247_vm3, %v1887_v58 }
 0x1a4   :  { %1408 = vset.pattern.permute.xlu1 %v1527_v55  ;;  %1410 = vset.pattern.permute.xlu0 %v1527_v55 }
 0x1a6   :  { %1355 = vmatmul.mubr.msk.f32.gmra.mrb[14].mxu0 %vm123_vm0, %v1880_v57 }
 0x269   :  { %v1324_v56 = vpop.f32.mrb[6].mxu0  ;;  %v1330_v57 = vpop.f32.mrb[0].mxu1 }
 0x26a   :  { %v1148_v47 = vmul.f32 -1.442695, %v1324_v56  ;;  %v350_v48 = vpop.f32.mrb[7].mxu0  ;;  %v1152_v60 = vmul.f32 -1.442695, %v1330_v57  ;;  %v370_v10 = vpop.f32.mrb[1].mxu1 }
 0x26b   :  { %v1147_v7 = vmul.f32 -1.442695, %v350_v48  ;;  %v1151_v23 = vmul.f32 -1.442695, %v370_v10 }
 0x26c   :  { %1423 = vpow2.f32 %v1148_v47 }
 0x26d   :  { %1425 = vpow2.f32 %v1147_v7  ;;  %v1327_v37 = vpop.f32.mrb[8].mxu0  ;;  %v1333_v16 = vpop.f32.mrb[2].mxu1 }
 0x26e   :  { %v360_v38 = vpop.f32.mrb[9].mxu0  ;;  %1427 = vpow2.f32 %v1152_v60  ;;  %v1150_v17 = vmul.f32 -1.442695, %v1327_v37  ;;  %v1154_v28 = vmul.f32 -1.442695, %v1333_v16 }
 0x26f   :  { %1429 = vpow2.f32 %v1151_v23  ;;  %v1149_v23 = vmul.f32 -1.442695, %v360_v38 }
 0x270   :  { %1431 = vpow2.f32 %v1150_v17 }
 0x271   :  { %v1350_v58 = vpop.f32.mrb[10].mxu0  ;;  %1433 = vpow2.f32 %v1154_v28 }
 0x272   :  { %v754_v40 = vpop.f32.mrb[11].mxu0  ;;  %v784_v29 = vmax.f32 %v1350_v58, 0.0 }
 0x273   :  { %v783_v39 = vmax.f32 %v754_v40, 0.0 }
 0x275   :  { %v1353_v11 = vpop.f32.mrb[12].mxu0 }
 0x276   :  { %v1424_v22 = vpop.eup %1423  ;;  %v786_v34 = vmax.f32 %v1353_v11, 0.0  ;;  %v764_v51 = vpop.f32.mrb[13].mxu0 }
 0x277   :  { %v1426_v52 = vpop.eup %1425  ;;  %v446_v35 = vadd.f32 1.0, %v1424_v22  ;;  %v785_v49 = vmax.f32 %v764_v51, 0.0 }
 0x278   :  { %v1428_v50 = vpop.eup %1427  ;;  %v445_v63 = vadd.f32 1.0, %v1426_v52  ;;  %v790_v56 = vsel %vm113_vm1, %v784_v29, %v786_v34  ;;  %v1528_v52 = vmov 1  }
 0x279   :  { %v1430_v57 = vpop.eup %1429  ;;  %1435 = vrcp.f32 %v446_v35  ;;  %v450_v47 = vadd.f32 1.0, %v1428_v50  ;;  %v789_v48 = vsel %vm113_vm1, %v783_v39, %v785_v49  ;;  %v1356_v60 = vpop.f32.mrb[14].mxu0 }
 0x27a   :  { %1437 = vrcp.f32 %v445_v63  ;;  %v788_v10 = vmax.f32 %v1356_v60, 0.0  ;;  %v774_v7 = vpop.f32.mrb[15].mxu0  ;;  %v449_v16 = vadd.f32 1.0, %v1430_v57  ;;  %v1432_v28 = vpop.eup %1431 }
 0x27b   :  { %v787_v37 = vmax.f32 %v774_v7, 0.0  ;;  %1439 = vrcp.f32 %v450_v47  ;;  %v1434_v11 = vpop.eup %1433  ;;  %v448_v29 = vadd.f32 1.0, %v1432_v28  ;;  %v1529_v28 = vmov 2  }
 0x27c   :  { %v792_v58 = vsel %vm118_vm2, %v790_v56, %v788_v10  ;;  %1441 = vpow2.f32 %v1149_v23  ;;  %v452_v51 = vadd.f32 1.0, %v1434_v11 }
 0x27d   :  { %v791_v17 = vsel %vm118_vm2, %v789_v48, %v787_v37  ;;  %1443 = vrcp.f32 %v449_v16 }
 0x27e   :  { %v1399_v40 = vpack.c.bf16 %v792_v58, %v791_v17  ;;  %1445 = vrcp.f32 %v448_v29 }
 0x27f   :  { %1447 = vrcp.f32 %v452_v51 }
 0x280   :  { %1400 = vmatprep.subr.bf16.mxu1 %v1399_v40 }
 0x281   :  { %1402 = vmatpush3.bf16.msra.mxu1 %v1399_v40 }
 0x283   :  { %v1436_v22 = vpop.eup %1435 }
 0x284   :  { %v1438_v34 = vpop.eup %1437  ;;  %488 = vperm.xlu1 %1408, %v1436_v22   ;;  %1362 = vmatmul.mubr.msk.f32.vlgmr.msra.gmra.mrb[8].mxu1 %vm247_vm3, %v1911_v42 }
 0x285   :  { %483 = vperm.xlu0 %1410, %v1438_v34   ;;  %1364 = vmatprep.mubr.msk.f32.mxu1 %vm247_vm3, %v1923_v61  ;;  %v1440_v38 = vpop.eup %1439 }
 0x286   :  { %v1442_v35 = vpop.eup %1441 }
 0x287   :  { %v1444_v39 = vpop.eup %1443  ;;  %v447_v42 = vadd.f32 1.0, %v1442_v35 }
 0x288   :  { %1409 = vset.pattern.permute.xlu1 %v1528_v52  ;;  %1365 = vmatmul.mubr.msk.f32.gmra.mrb[10].mxu1 %vm247_vm3, %v1939_v3  ;;  %v1446_v61 = vpop.eup %1445 }
 0x289   :  { %532 = vperm.xlu1 %1409, %v1440_v38   ;;  %1367 = vmatprep.mubr.msk.f32.mxu1 %vm247_vm3, %v1894_v59  ;;  %1449 = vrcp.f32 %v447_v42  ;;  %v1448_v59 = vpop.eup %1447 }
 0x28a   :  { %1415 = vset.pattern.permute.xlu0 %v1529_v28 }
 0x28c   :  { %1368 = vmatmul.mubr.msk.f32.gmra.mrb[12].mxu1 %vm247_vm3, %v1918_v43 }
 0x28d   :  { %527 = vperm.xlu1 %1409, %v1444_v39   ;;  %1370 = vmatprep.mubr.msk.f32.mxu1 %vm247_vm3, %v1928_v62  ;;  %v380_v62 = vpop.f32.mrb[3].mxu1 }
 0x28e   :  { %v1153_v3 = vmul.f32 -1.442695, %v380_v62 }
 0x290   :  { %1371 = vmatmul.mubr.msk.f32.gmra.mrb[14].mxu1 %vm247_vm3, %v1944_v41  ;;  %1451 = vpow2.f32 %v1153_v3 }
 0x291   :  { %1411 = vset.pattern.permute.xlu1 %v1527_v55  ;;  %1373 = vmatprep.mubr.msk.f32.mxu1 %vm247_vm3, %v1967_v44 }
 0x292   :  { %498 = vperm.xlu1 %1411, %v1446_v61  }
 0x293   :  { %v1450_v43 = vpop.eup %1449 }
 0x294   :  { %1374 = vmatmul.mubr.msk.f32.gmra.mrb[16].mxu1 %vm247_vm3, %v1974_v36 }
 0x295   :  { %1376 = vmatprep.mubr.msk.f32.mxu1 %vm247_vm3, %v1981_v53  ;;  %v1336_v53 = vpop.f32.mrb[4].mxu1 }
 0x296   :  { %1412 = vset.pattern.permute.xlu1 %v1528_v52  ;;  %v1156_v49 = vmul.f32 -1.442695, %v1336_v53  ;;  %v390_v50 = vpop.f32.mrb[5].mxu1 }
 0x297   :  { %542 = vperm.xlu1 %1412, %v1448_v59   ;;  %v1155_v63 = vmul.f32 -1.442695, %v390_v50 }
 0x298   :  { %1377 = vmatmul.mubr.msk.f32.gmra.mrb[18].mxu1 %vm247_vm3, %v1988_v54  ;;  %v1339_v54 = vpop.f32.mrb[6].mxu1 }
 0x299   :  { %v1158_v56 = vmul.f32 -1.442695, %v1339_v54  ;;  %v400_v57 = vpop.f32.mrb[7].mxu1 }
 0x29a   :  { %v1452_v41 = vpop.eup %1451  ;;  %v1157_v47 = vmul.f32 -1.442695, %v400_v57 }
 0x29b   :  { %1413 = vset.pattern.permute.xlu1 %v1527_v55  ;;  %v451_v44 = vadd.f32 1.0, %v1452_v41 }
 0x29c   :  { %493 = vperm.xlu1 %1413, %v1450_v43  }
 0x29d   :  { %1453 = vrcp.f32 %v451_v44 }
 0x29e   :  { %1455 = vpow2.f32 %v1156_v49 }
 0x29f   :  { %1457 = vpow2.f32 %v1155_v63 }
 0x2a0   :  { %1414 = vset.pattern.permute.xlu1 %v1528_v52  ;;  %1459 = vpow2.f32 %v1158_v56 }
 0x2a1   :  { %1461 = vpow2.f32 %v1157_v47 }
 0x2a7   :  { %v1454_v36 = vpop.eup %1453 }
 0x2a8   :  { %537 = vperm.xlu1 %1414, %v1454_v36   ;;  %v1456_v48 = vpop.eup %1455 }
 0x2a9   :  { %v1458_v60 = vpop.eup %1457  ;;  %v454_v10 = vadd.f32 1.0, %v1456_v48 }
 0x2aa   :  { %v453_v7 = vadd.f32 1.0, %v1458_v60  ;;  %v1460_v23 = vpop.eup %1459 }
 0x2ab   :  { %1463 = vrcp.f32 %v454_v10  ;;  %v1462_v37 = vpop.eup %1461  ;;  %v456_v16 = vadd.f32 1.0, %v1460_v23 }
 0x2ac   :  { %1465 = vrcp.f32 %v453_v7  ;;  %v455_v58 = vadd.f32 1.0, %v1462_v37  ;;  %1416 = vset.pattern.permute.xlu1 %v1529_v28 }
 0x2ad   :  { %1467 = vrcp.f32 %v456_v16 }
 0x2ae   :  { %1469 = vrcp.f32 %v455_v58 }
 0x2b5   :  { %v1464_v17 = vpop.eup %1463 }
 0x2b6   :  { %v1466_v40 = vpop.eup %1465  ;;  %576 = vperm.xlu0 %1415, %v1464_v17  }
 0x2b7   :  { %571 = vperm.xlu1 %1416, %v1466_v40   ;;  %v1468_v11 = vpop.eup %1467 }
 0x2b8   :  { %v1470_v22 = vpop.eup %1469 }
 0x2ba   :  { %1418 = vset.pattern.permute.xlu0 %v1527_v55 }
 0x2bb   :  { %586 = vperm.xlu1 %1416, %v1468_v11  }
 0x2bf   :  { %581 = vperm.xlu1 %1416, %v1470_v22  }
 0x2c3   :  { %1417 = vset.pattern.permute.xlu1 %v1527_v55 }
 0x303   :  { %v489_v29 = vpop.permute.xlu1 %488 }
 0x304   :  { %v503_v34 = vmul.f32 %v489_v29, %v1607_v8  ;;  %v504_v38 = vmul.f32 %v489_v29, %v1612_v9  ;;  %v484_v51 = vpop.permute.xlu0 %483 }
 0x305   :  { %v501_v35 = vmul.f32 %v484_v51, %v1583_v2  ;;  %v502_v39 = vmul.f32 %v484_v51, %v1590_v4 }
 0x306   :  { %511 = vst [vmem:[%s2248_s5 + $0x10] sm:$0xff] %v503_v34  ;;  %512 = vst [vmem:[%s2248_s5 + $0x18] sm:$0xff] %v504_v38 }
 0x307   :  { %509 = vst [vmem:[%s2248_s5] sm:$0xff] %v501_v35  ;;  %510 = vst [vmem:[%s2248_s5 + $0x8] sm:$0xff] %v502_v39 }
 0x308   :  { %v533_v8 = vpop.permute.xlu1 %532 }
 0x309   :  { %v547_v2 = vmul.f32 %v533_v8, %v1631_v14  ;;  %v548_v4 = vmul.f32 %v533_v8, %v1636_v15 }
 0x30b   :  { %555 = vst [vmem:[%s2249_s6 + $0x10] sm:$0xff] %v547_v2  ;;  %556 = vst [vmem:[%s2249_s6 + $0x18] sm:$0xff] %v548_v4 }
 0x30c   :  { %v528_v9 = vpop.permute.xlu1 %527 }
 0x30d   :  { %v545_v55 = vmul.f32 %v528_v9, %v1621_v12  ;;  %v546_v42 = vmul.f32 %v528_v9, %v1626_v13 }
 0x30f   :  { %553 = vst [vmem:[%s2249_s6] sm:$0xff] %v545_v55  ;;  %554 = vst [vmem:[%s2249_s6 + $0x8] sm:$0xff] %v546_v42 }
 0x311   :  { %v499_v14 = vpop.permute.xlu1 %498 }
 0x312   :  { %v507_v15 = vmul.f32 %v499_v14, %v1679_v26  ;;  %v508_v61 = vmul.f32 %v499_v14, %v1684_v27 }
 0x314   :  { %515 = vst [vmem:[%s2248_s5 + $0x30] sm:$0xff] %v507_v15  ;;  %516 = vst [vmem:[%s2248_s5 + $0x38] sm:$0xff] %v508_v61 }
 0x316   :  { %v543_v12 = vpop.permute.xlu1 %542 }
 0x317   :  { %v551_v13 = vmul.f32 %v543_v12, %v1703_v32  ;;  %v552_v59 = vmul.f32 %v543_v12, %v1708_v33 }
 0x319   :  { %559 = vst [vmem:[%s2249_s6 + $0x30] sm:$0xff] %v551_v13  ;;  %560 = vst [vmem:[%s2249_s6 + $0x38] sm:$0xff] %v552_v59 }
 0x31b   :  { %v494_v26 = vpop.permute.xlu1 %493 }
 0x31c   :  { %v505_v27 = vmul.f32 %v494_v26, %v1669_v24  ;;  %v506_v43 = vmul.f32 %v494_v26, %v1674_v25 }
 0x31e   :  { %513 = vst [vmem:[%s2248_s5 + $0x20] sm:$0xff] %v505_v27  ;;  %514 = vst [vmem:[%s2248_s5 + $0x28] sm:$0xff] %v506_v43 }
 0x327   :  { %v538_v32 = vpop.permute.xlu1 %537 }
 0x328   :  { %v549_v33 = vmul.f32 %v538_v32, %v1693_v30  ;;  %v550_v62 = vmul.f32 %v538_v32, %v1698_v31 }
 0x32a   :  { %557 = vst [vmem:[%s2249_s6 + $0x20] sm:$0xff] %v549_v33  ;;  %558 = vst [vmem:[%s2249_s6 + $0x28] sm:$0xff] %v550_v62 }
 0x335   :  { %v577_v31 = vpop.permute.xlu0 %576 }
 0x336   :  { %v572_v49 = vpop.permute.xlu1 %571  ;;  %v591_v54 = vmul.f32 %v577_v31, %v1595_v5  ;;  %v592_v57 = vmul.f32 %v577_v31, %v1600_v6 }
 0x337   :  { %v589_v50 = vmul.f32 %v572_v49, %v1573_v0  ;;  %v590_v63 = vmul.f32 %v572_v49, %v1578_v1 }
 0x338   :  { %599 = vst [vmem:[%s2250_s7 + $0x10] sm:$0xff] %v591_v54  ;;  %600 = vst [vmem:[%s2250_s7 + $0x18] sm:$0xff] %v592_v57 }
 0x339   :  { %597 = vst [vmem:[%s2250_s7] sm:$0xff] %v589_v50  ;;  %598 = vst [vmem:[%s2250_s7 + $0x8] sm:$0xff] %v590_v63 }
 0x33a   :  { %v587_v1 = vpop.permute.xlu1 %586 }
 0x33b   :  { %v595_v5 = vmul.f32 %v587_v1, %v1655_v20  ;;  %v596_v6 = vmul.f32 %v587_v1, %v1660_v21 }
 0x33d   :  { %603 = vst [vmem:[%s2250_s7 + $0x30] sm:$0xff] %v595_v5  ;;  %604 = vst [vmem:[%s2250_s7 + $0x38] sm:$0xff] %v596_v6  ;;  %v2282_v6 = vld [vmem:[#allocation9_spill] sm:$0xff] }
 0x33e   :  { %v582_v17 = vpop.permute.xlu1 %581 }
 0x33f   :  { %v593_v21 = vmul.f32 %v582_v17, %v1645_v18  ;;  %v594_v40 = vmul.f32 %v582_v17, %v1650_v19  ;;  %v2285_v17 = vld [vmem:[#allocation4_spill] sm:$0xff] }
 0x341   :  { %601 = vst [vmem:[%s2250_s7 + $0x20] sm:$0xff] %v593_v21  ;;  %602 = vst [vmem:[%s2250_s7 + $0x28] sm:$0xff] %v594_v40  ;;  %v2286_v21 = vld [vmem:[#allocation5_spill] sm:$0xff] }
 0x357   :  { %v1363_v24 = vpop.f32.mrb[8].mxu1 }
 0x358   :  { %v1202_v25 = vmul.f32 -1.442695, %v1363_v24  ;;  %v859_v3 = vpop.f32.mrb[9].mxu1 }
 0x359   :  { %v1201_v41 = vmul.f32 -1.442695, %v859_v3 }
 0x35a   :  { %1471 = vpow2.f32 %v1202_v25 }
 0x35b   :  { %1473 = vpow2.f32 %v1201_v41  ;;  %v1366_v44 = vpop.f32.mrb[10].mxu1 }
 0x35c   :  { %v1204_v36 = vmul.f32 -1.442695, %v1366_v44  ;;  %v869_v53 = vpop.f32.mrb[11].mxu1 }
 0x35d   :  { %v1203_v30 = vmul.f32 -1.442695, %v869_v53 }
 0x35e   :  { %1475 = vpow2.f32 %v1204_v36 }
 0x35f   :  { %1477 = vpow2.f32 %v1203_v30  ;;  %v1369_v56 = vpop.f32.mrb[12].mxu1 }
 0x360   :  { %v1206_v47 = vmul.f32 -1.442695, %v1369_v56  ;;  %v879_v48 = vpop.f32.mrb[13].mxu1 }
 0x361   :  { %v1205_v0 = vmul.f32 -1.442695, %v879_v48 }
 0x362   :  { %1479 = vpow2.f32 %v1206_v47  ;;  %v2279_v47 = vld [vmem:[#allocation2_spill] sm:$0xff] }
 0x363   :  { %1481 = vpow2.f32 %v1205_v0  ;;  %v1372_v60 = vpop.f32.mrb[14].mxu1  ;;  %v2280_v0 = vld [vmem:[#allocation3_spill] sm:$0xff] }
 0x364   :  { %v1472_v10 = vpop.eup %1471  ;;  %v1208_v7 = vmul.f32 -1.442695, %v1372_v60  ;;  %v889_v23 = vpop.f32.mrb[15].mxu1 }
 0x365   :  { %v1474_v37 = vpop.eup %1473  ;;  %v955_v16 = vadd.f32 1.0, %v1472_v10  ;;  %v1207_v58 = vmul.f32 -1.442695, %v889_v23  ;;  %v2283_v10 = vld [vmem:[#allocation10_spill] sm:$0xff]  ;;  %v2284_v23 = vld [vmem:[#allocation11_spill] sm:$0xff] }
 0x366   :  { %v954_v20 = vadd.f32 1.0, %v1474_v37  ;;  %1483 = vpow2.f32 %v1208_v7 }
 0x367   :  { %1485 = vrcp.f32 %v955_v16  ;;  %v1375_v11 = vpop.f32.mrb[16].mxu1 }
 0x368   :  { %v1476_v22 = vpop.eup %1475  ;;  %1487 = vrcp.f32 %v954_v20  ;;  %v1210_v29 = vmul.f32 -1.442695, %v1375_v11  ;;  %v899_v34 = vpop.f32.mrb[17].mxu1  ;;  %v2287_v11 = vld [vmem:[#allocation6_spill] sm:$0xff] }
 0x369   :  { %v1478_v38 = vpop.eup %1477  ;;  %v957_v51 = vadd.f32 1.0, %v1476_v22  ;;  %1489 = vpow2.f32 %v1207_v58  ;;  %v1209_v18 = vmul.f32 -1.442695, %v899_v34 }
 0x36a   :  { %v956_v35 = vadd.f32 1.0, %v1478_v38  ;;  %1491 = vpow2.f32 %v1210_v29  ;;  %v2288_v29 = vld [vmem:[#allocation7_spill] sm:$0xff] }
 0x36b   :  { %1493 = vrcp.f32 %v957_v51  ;;  %v1378_v19 = vpop.f32.mrb[18].mxu1  ;;  %v2289_v51 = vld [vmem:[#allocation14_spill] sm:$0xff] }
 0x36c   :  { %v1480_v39 = vpop.eup %1479  ;;  %1495 = vrcp.f32 %v956_v35  ;;  %v1212_v8 = vmul.f32 -1.442695, %v1378_v19  ;;  %v909_v2 = vpop.f32.mrb[19].mxu1  ;;  %v2290_v35 = vld [vmem:[#allocation15_spill] sm:$0xff] }
 0x36d   :  { %v1482_v4 = vpop.eup %1481  ;;  %v959_v9 = vadd.f32 1.0, %v1480_v39  ;;  %1497 = vpow2.f32 %v1209_v18  ;;  %v1211_v55 = vmul.f32 -1.442695, %v909_v2 }
 0x36e   :  { %v958_v42 = vadd.f32 1.0, %v1482_v4  ;;  %1499 = vpow2.f32 %v1212_v8  ;;  %v2291_v8 = vld [vmem:[#allocation12_spill] sm:$0xff]  ;;  %v2292_v4 = vld [vmem:[#allocation13_spill] sm:$0xff] }
 0x36f   :  { %1501 = vrcp.f32 %v959_v9 }
 0x370   :  { %v1484_v14 = vpop.eup %1483  ;;  %1503 = vrcp.f32 %v958_v42  ;;  %v1519_v42 = vld [vmem:[%s2243_s2 + $0x40] sm:$0xff] }
 0x371   :  { %v1486_v15 = vpop.eup %1485  ;;  %v961_v61 = vadd.f32 1.0, %v1484_v14  ;;  %1505 = vpow2.f32 %v1211_v55 }
 0x372   :  { %v1488_v12 = vpop.eup %1487  ;;  %997 = vperm.xlu1 %1417, %v1486_v15   ;;  %v1520_v15 = vld [vmem:[%s2243_s2 + $0x48] sm:$0xff] }
 0x373   :  { %v1490_v13 = vpop.eup %1489  ;;  %1507 = vrcp.f32 %v961_v61  ;;  %992 = vperm.xlu0 %1418, %v1488_v12  }
 0x374   :  { %v1492_v59 = vpop.eup %1491  ;;  %v960_v27 = vadd.f32 1.0, %v1490_v13 }
 0x375   :  { %v1494_v26 = vpop.eup %1493  ;;  %v963_v33 = vadd.f32 1.0, %v1492_v59  ;;  %v1521_v59 = vld [vmem:[%s2243_s2 + $0x50] sm:$0xff] }
 0x376   :  { %v1496_v43 = vpop.eup %1495  ;;  %1509 = vrcp.f32 %v960_v27  ;;  %v1522_v27 = vld [vmem:[%s2243_s2 + $0x58] sm:$0xff] }
 0x377   :  { %v1498_v32 = vpop.eup %1497  ;;  %1002 = vperm.xlu1 %1417, %v1496_v43   ;;  %1007 = vperm.xlu0 %1418, %v1494_v26  }
 0x378   :  { %v1500_v62 = vpop.eup %1499  ;;  %v962_v24 = vadd.f32 1.0, %v1498_v32  ;;  %v1523_v32 = vld [vmem:[%s2243_s2 + $0x70] sm:$0xff] }
 0x379   :  { %v1502_v25 = vpop.eup %1501  ;;  %v965_v3 = vadd.f32 1.0, %v1500_v62  ;;  %v1524_v62 = vld [vmem:[%s2243_s2 + $0x78] sm:$0xff] }
 0x37a   :  { %v1504_v41 = vpop.eup %1503  ;;  %1511 = vrcp.f32 %v962_v24 }
 0x37b   :  { %v1506_v44 = vpop.eup %1505  ;;  %1513 = vrcp.f32 %v963_v33  ;;  %1420 = vset.pattern.permute.xlu1 %v1528_v52  ;;  %1419 = vset.pattern.permute.xlu0 %v1528_v52 }
 0x37c   :  { %1515 = vrcp.f32 %v965_v3  ;;  %v964_v36 = vadd.f32 1.0, %v1506_v44  ;;  %1037 = vperm.xlu1 %1420, %v1504_v41   ;;  %1042 = vperm.xlu0 %1419, %v1502_v25   ;;  %v1525_v3 = vld [vmem:[%s2243_s2 + $0x60] sm:$0xff]  ;;  %v1526_v44 = vld [vmem:[%s2243_s2 + $0x68] sm:$0xff] }
 0x37d   :  { %v1508_v53 = vpop.eup %1507 }
 0x37e   :  { %1517 = vrcp.f32 %v964_v36 }
 0x380   :  { %1052 = vperm.xlu1 %1420, %v1508_v53   ;;  %1422 = vset.pattern.permute.xlu0 %v1529_v28  ;;  %v1510_v30 = vpop.eup %1509 }
 0x384   :  { %v1512_v49 = vpop.eup %1511  ;;  %1047 = vperm.xlu1 %1420, %v1510_v30  }
 0x385   :  { %v1514_v31 = vpop.eup %1513  ;;  %1082 = vperm.xlu0 %1422, %v1512_v49  }
 0x386   :  { %v1516_v50 = vpop.eup %1515 }
 0x388   :  { %1421 = vset.pattern.permute.xlu1 %v1529_v28  ;;  %v1518_v52 = vpop.eup %1517  ;;  %v2281_v28 = vld [vmem:[#allocation8_spill] sm:$0xff] }
 0x389   :  { %1087 = vperm.xlu1 %1421, %v1514_v31   ;;  %1097 = vperm.xlu0 %1422, %v1516_v50  }
 0x38d   :  { %1092 = vperm.xlu1 %1421, %v1518_v52  }
 0x3f1   :  { %v998_v63 = vpop.permute.xlu1 %997 }
 0x3f2   :  { %v1012_v54 = vmul.f32 %v1746_v45, %v998_v63  ;;  %v1013_v56 = vmul.f32 %v1751_v46, %v998_v63  ;;  %v993_v57 = vpop.permute.xlu0 %992 }
 0x3f3   :  { %v1010_v48 = vmul.f32 %v2279_v47, %v993_v57  ;;  %v1011_v1 = vmul.f32 %v2280_v0, %v993_v57 }
 0x3f4   :  { %1215 = vst [vmem:[%s2248_s5 + $0x50] sm:$0xff] %v1012_v54  ;;  %1216 = vst [vmem:[%s2248_s5 + $0x58] sm:$0xff] %v1013_v56 }
 0x3f5   :  { %1213 = vst [vmem:[%s2248_s5 + $0x40] sm:$0xff] %v1010_v48  ;;  %1214 = vst [vmem:[%s2248_s5 + $0x48] sm:$0xff] %v1011_v1 }
 0x3f6   :  { %v1003_v45 = vpop.permute.xlu1 %1002  ;;  %v1008_v46 = vpop.permute.xlu0 %1007 }
 0x3f7   :  { %v1014_v5 = vmul.f32 %v2281_v28, %v1003_v45  ;;  %v1015_v60 = vmul.f32 %v2282_v6, %v1003_v45  ;;  %v1016_v7 = vmul.f32 %v2283_v10, %v1008_v46  ;;  %v1017_v37 = vmul.f32 %v2284_v23, %v1008_v46 }
 0x3f9   :  { %1217 = vst [vmem:[%s2248_s5 + $0x60] sm:$0xff] %v1014_v5  ;;  %1218 = vst [vmem:[%s2248_s5 + $0x68] sm:$0xff] %v1015_v60 }
 0x3fa   :  { %1219 = vst [vmem:[%s2248_s5 + $0x70] sm:$0xff] %v1016_v7  ;;  %1220 = vst [vmem:[%s2248_s5 + $0x78] sm:$0xff] %v1017_v37 }
 0x3fb   :  { %v1038_v16 = vpop.permute.xlu1 %1037  ;;  %v1043_v58 = vpop.permute.xlu0 %1042 }
 0x3fc   :  { %v1055_v20 = vmul.f32 %v2285_v17, %v1038_v16  ;;  %v1056_v40 = vmul.f32 %v2286_v21, %v1038_v16  ;;  %v1057_v22 = vmul.f32 %v2287_v11, %v1043_v58  ;;  %v1058_v34 = vmul.f32 %v2288_v29, %v1043_v58 }
 0x3fe   :  { %1229 = vst [vmem:[%s2249_s6 + $0x40] sm:$0xff] %v1055_v20  ;;  %1230 = vst [vmem:[%s2249_s6 + $0x48] sm:$0xff] %v1056_v40 }
 0x3ff   :  { %1231 = vst [vmem:[%s2249_s6 + $0x50] sm:$0xff] %v1057_v22  ;;  %1232 = vst [vmem:[%s2249_s6 + $0x58] sm:$0xff] %v1058_v34  ;;  %v1053_v38 = vpop.permute.xlu1 %1052 }
 0x400   :  { %v1061_v18 = vmul.f32 %v2289_v51, %v1053_v38  ;;  %v1062_v19 = vmul.f32 %v2290_v35, %v1053_v38 }
 0x402   :  { %1235 = vst [vmem:[%s2249_s6 + $0x70] sm:$0xff] %v1061_v18  ;;  %1236 = vst [vmem:[%s2249_s6 + $0x78] sm:$0xff] %v1062_v19 }
 0x403   :  { %v1048_v39 = vpop.permute.xlu1 %1047 }
 0x404   :  { %v1059_v2 = vmul.f32 %v2291_v8, %v1048_v39  ;;  %v1060_v9 = vmul.f32 %v2292_v4, %v1048_v39  ;;  %v1083_v55 = vpop.permute.xlu0 %1082 }
 0x405   :  { %v1100_v14 = vmul.f32 %v1519_v42, %v1083_v55  ;;  %v1101_v61 = vmul.f32 %v1520_v15, %v1083_v55 }
 0x406   :  { %1233 = vst [vmem:[%s2249_s6 + $0x60] sm:$0xff] %v1059_v2  ;;  %1234 = vst [vmem:[%s2249_s6 + $0x68] sm:$0xff] %v1060_v9 }
 0x407   :  { %1245 = vst [vmem:[%s2250_s7 + $0x40] sm:$0xff] %v1100_v14  ;;  %1246 = vst [vmem:[%s2250_s7 + $0x48] sm:$0xff] %v1101_v61 }
 0x408   :  { %v1088_v12 = vpop.permute.xlu1 %1087  ;;  %v1098_v13 = vpop.permute.xlu0 %1097 }
 0x409   :  { %v1102_v26 = vmul.f32 %v1521_v59, %v1088_v12  ;;  %v1103_v43 = vmul.f32 %v1522_v27, %v1088_v12  ;;  %v1106_v33 = vmul.f32 %v1523_v32, %v1098_v13  ;;  %v1107_v24 = vmul.f32 %v1524_v62, %v1098_v13 }
 0x40b   :  { %1247 = vst [vmem:[%s2250_s7 + $0x50] sm:$0xff] %v1102_v26  ;;  %1248 = vst [vmem:[%s2250_s7 + $0x58] sm:$0xff] %v1103_v43 }
 0x40c   :  { %1251 = vst [vmem:[%s2250_s7 + $0x70] sm:$0xff] %v1106_v33  ;;  %1252 = vst [vmem:[%s2250_s7 + $0x78] sm:$0xff] %v1107_v24  ;;  %v1093_v25 = vpop.permute.xlu1 %1092 }
 0x40d   :  { %v1104_v41 = vmul.f32 %v1525_v3, %v1093_v25  ;;  %v1105_v36 = vmul.f32 %v1526_v44, %v1093_v25 }
 0x40f   :  { %1249 = vst [vmem:[%s2250_s7 + $0x60] sm:$0xff] %v1104_v41  ;;  %1250 = vst [vmem:[%s2250_s7 + $0x68] sm:$0xff] %v1105_v36 }

</bundles_post_ra>
